<compile_context>
chip_gen: v7x
topology: tpu7x:2x2x1
jax: 0.10.0
libtpu: 0.0.40
codegen_flags: <defaults>
</compile_context>

<pallas_src>
import functools
from collections import namedtuple

import jax
import jax.numpy as jnp
from jax.experimental import pallas as pl
from jax.experimental.pallas import tpu as pltpu  # noqa: F401  (TPU backend)

Params = namedtuple("Params", ["z", "mu", "logvar"])
LATENT_VARS = ("V", "A", "D")
N_VAR = 3
OUTPUT_DIM = 300
D_PAD = 384  # 300 rounded up to a multiple of 128 -> lane-dense stores


# ----------------------------- Pallas kernels -------------------------------
def _prior_kernel(x_ref, w_ref, b_ref, eps_ref, wreg_ref, breg_ref, vad_ref,
                  y_ref, z_ref, loss_ref, *, n_var, d_pad):
    """One fused matmul for all 3 variables x {mu, logvar} + reparam + VAD MSE.

    Column layout of w/b/y: [mu_V | mu_A | mu_D | lv_V | lv_A | lv_D],
    each block d_pad wide (zero padded beyond OUTPUT_DIM).
    """
    half = n_var * d_pad
    x = x_ref[...].astype(jnp.bfloat16)                          # [B, Din]
    y = jnp.dot(x, w_ref[...], preferred_element_type=jnp.float32) + b_ref[...]
    y = jnp.maximum(y, 0.0)                                      # ReLU on mu and logvar
    mu_all = y[:, :half]                                         # [B, 3*d_pad]
    lv_all = y[:, half:]                                         # [B, 3*d_pad]
    z_all = mu_all + eps_ref[...].astype(jnp.float32) * jnp.exp(0.5 * lv_all)

    y_ref[...] = y                                               # lane-dense store
    z_ref[...] = z_all                                           # lane-dense store

    # latent2regression (300 -> 1, zero-padded weights) + sigmoid + MSE 'sum'
    wreg = wreg_ref[...]                                         # [n_var, d_pad]
    breg = breg_ref[...]                                         # [1, n_var]
    vad = vad_ref[...]                                           # [B, n_var]
    sq = jnp.zeros((x.shape[0], 1), jnp.float32)
    for v in range(n_var):
        zv = z_all[:, v * d_pad:(v + 1) * d_pad]
        logit = jnp.sum(zv * wreg[v:v + 1, :], axis=-1, keepdims=True) + breg[:, v:v + 1]
        pred = jax.nn.sigmoid(logit)
        diff = pred - vad[:, v:v + 1]
        sq = sq + diff * diff
    loss_ref[...] = jnp.sum(sq, keepdims=True)                   # written once


def _posterior_kernel(x_ref, w_ref, b_ref, eps_ref, y_ref, z_ref, *, n_var, d_pad):
    """Per-variable x (context ++ vad_rep_v); mu|logvar fused per variable.

    No regression / loss work in this branch (results were unused anyway).
    """
    mus, lvs = [], []
    for v in range(n_var):                                       # unrolled (static)
        xv = x_ref[v].astype(jnp.bfloat16)                       # [B, 2*Din]
        yv = jnp.dot(xv, w_ref[v], preferred_element_type=jnp.float32) + b_ref[v]
        yv = jnp.maximum(yv, 0.0)                                # [B, 2*d_pad]: [mu_v|lv_v]
        mus.append(yv[:, :d_pad])
        lvs.append(yv[:, d_pad:])
    mu_all = jnp.concatenate(mus, axis=-1)                       # [B, 3*d_pad]
    lv_all = jnp.concatenate(lvs, axis=-1)
    z_all = mu_all + eps_ref[...].astype(jnp.float32) * jnp.exp(0.5 * lv_all)
    y_ref[...] = jnp.concatenate([mu_all, lv_all], axis=-1)      # same layout as prior
    z_ref[...] = z_all


# --------------------------- pallas_call wrappers ----------------------------
@jax.jit
def _run_prior(x, w, b, eps, wreg, breg, vad):
    B = x.shape[0]
    return pl.pallas_call(
        functools.partial(_prior_kernel, n_var=N_VAR, d_pad=D_PAD),
        out_shape=(
            jax.ShapeDtypeStruct((B, 2 * N_VAR * D_PAD), jnp.float32),  # [mu_all|lv_all]
            jax.ShapeDtypeStruct((B, N_VAR * D_PAD), jnp.float32),      # z_all
            jax.ShapeDtypeStruct((1, 1), jnp.float32),                  # sum sq err
        ),
    )(x, w, b, eps, wreg, breg, vad)


@jax.jit
def _run_posterior(x3, w, b, eps):
    B = x3.shape[1]
    return pl.pallas_call(
        functools.partial(_posterior_kernel, n_var=N_VAR, d_pad=D_PAD),
        out_shape=(
            jax.ShapeDtypeStruct((B, 2 * N_VAR * D_PAD), jnp.float32),
            jax.ShapeDtypeStruct((B, N_VAR * D_PAD), jnp.float32),
        ),
    )(x3, w, b, eps)


# ------------------------------ model wrapper --------------------------------
def _linear_init(key, fan_in, fan_out):
    bound = 1.0 / jnp.sqrt(jnp.float32(fan_in))
    kw, kb = jax.random.split(key)
    w = jax.random.uniform(kw, (fan_in, fan_out), jnp.float32, -bound, bound)
    b = jax.random.uniform(kb, (fan_out,), jnp.float32, -bound, bound)
    return w, b


def _pad_last(a, target):
    pad = target - a.shape[-1]
    return jnp.pad(a, [(0, 0)] * (a.ndim - 1) + [(0, pad)])


class VariationalLatentVADPallas:
    def __init__(self, emotions, input_dim, hidden_dim, key):
        self.idx2emo = {v: k for k, v in emotions.items()}
        self.input_dim = input_dim
        self.hidden_dim = hidden_dim
        self.output_dim = OUTPUT_DIM
        n_emo = len(emotions)

        keys = jax.random.split(key, 20)
        ki = iter(range(20))

        # TODO(synk): init_emo_vad_val is not defined in the reference source;
        # use a deterministic synthetic VAD table in (0, 1).
        self.vad_emo = jax.random.uniform(keys[next(ki)], (n_emo, 3), jnp.float32)

        def make_layers(fan_in):
            ws, bs = [], []
            for _ in LATENT_VARS:
                w, b = _linear_init(keys[next(ki)], fan_in, OUTPUT_DIM)
                ws.append(w)
                bs.append(b)
            return ws, bs

        wmu_p, bmu_p = make_layers(input_dim)          # context2params mu
        wlv_p, blv_p = make_layers(input_dim)          # context2params logvar
        wmu_q, bmu_q = make_layers(2 * input_dim)      # params2posterior mu
        wlv_q, blv_q = make_layers(2 * input_dim)      # params2posterior logvar

        # Prior: one fused weight [Din, 6*D_PAD] (bf16) + bias [1, 6*D_PAD] (f32)
        self.w_prior = jnp.concatenate(
            [_pad_last(w, D_PAD) for w in wmu_p] +
            [_pad_last(w, D_PAD) for w in wlv_p], axis=-1).astype(jnp.bfloat16)
        self.b_prior = jnp.concatenate(
            [_pad_last(b[None, :], D_PAD) for b in bmu_p] +
            [_pad_last(b[None, :], D_PAD) for b in blv_p], axis=-1)

        # Posterior: per-variable fused [2*Din, 2*D_PAD] (bf16) + bias [1, 2*D_PAD]
        self.w_post = jnp.stack([
            jnp.concatenate([_pad_last(wmu_q[v], D_PAD),
                             _pad_last(wlv_q[v], D_PAD)], axis=-1)
            for v in range(N_VAR)]).astype(jnp.bfloat16)
        self.b_post = jnp.stack([
            jnp.concatenate([_pad_last(bmu_q[v][None, :], D_PAD),
                             _pad_last(blv_q[v][None, :], D_PAD)], axis=-1)
            for v in range(N_VAR)])

        # latent2regression: Linear(300 -> 1) per variable, zero padded to D_PAD
        wr, br = [], []
        for _ in LATENT_VARS:
            w, b = _linear_init(keys[next(ki)], OUTPUT_DIM, 1)
            wr.append(jnp.pad(w[:, 0], (0, D_PAD - OUTPUT_DIM)))
            br.append(b[0])
        self.wreg = jnp.stack(wr)                                # [3, D_PAD] f32
        self.breg = jnp.asarray(br, jnp.float32)[None, :]        # [1, 3] f32

    def get_vad(self, emo_context_label):
        return self.vad_emo[jnp.asarray(emo_context_label, jnp.int32)]  # [B, 3]

    @staticmethod
    def _unpack(y, z):
        half = N_VAR * D_PAD
        params = {}
        for v, name in enumerate(LATENT_VARS):
            mu = y[:, v * D_PAD: v * D_PAD + OUTPUT_DIM]
            lv = y[:, half + v * D_PAD: half + v * D_PAD + OUTPUT_DIM]
            zz = z[:, v * D_PAD: v * D_PAD + OUTPUT_DIM]
            params[name] = Params(zz, mu, lv)
        return params

    def forward(self, context, mask_src, emo_context_label, enc_batch,
                mode="prior", vad_rep=None, rng_key=None):
        B = context.shape[0]
        if rng_key is None:
            rng_key = jax.random.PRNGKey(1)
        # epsilon ~ N(0,1) (torch.randn_like); padded lanes never reach the
        # 300-wide slices returned below, so padding needs no zeroing.
        eps = jax.random.normal(rng_key, (B, N_VAR * D_PAD), jnp.bfloat16)
        x = context[:, 0]                                        # [B, D_in]

        if mode == "prior":
            vad_values = self.get_vad(emo_context_label)         # [B, 3]
            y, z, sse = _run_prior(x, self.w_prior, self.b_prior, eps,
                                   self.wreg, self.breg, vad_values)
            latent_params = self._unpack(y, z)
            # TODO(synk): config.batch_size assumed equal to runtime B.
            vad_loss = sse[0, 0] / jnp.float32(B)
            # TODO(synk): EmotionInputDecoder('self_att') is not defined in the
            # reference source; return z.unsqueeze(1) per variable unchanged.
            z_context = [latent_params[name].z[:, None, :] for name in LATENT_VARS]
            return z_context, vad_loss, latent_params
        else:
            x3 = jnp.stack([
                jnp.concatenate([x, vad_rep[0][:, 0]], axis=-1),
                jnp.concatenate([x, vad_rep[1][:, 0]], axis=-1),
                jnp.concatenate([x, vad_rep[2][:, 0]], axis=-1),
            ])                                                    # [3, B, 2*D_in]
            y, z = _run_posterior(x3, self.w_post, self.b_post, eps)
            return self._unpack(y, z)


# ----------------------------------- main ------------------------------------
if __name__ == "__main__":
    B, S, D_in, H = 2, 8, 32, 64
    emotions = {"joy": 0, "sad": 1, "anger": 2, "fear": 3, "surprise": 4,
                "disgust": 5, "neutral": 6}

    root = jax.random.PRNGKey(0)
    k_model, k_ctx, k_vad0, k_vad1, k_vad2, k_eps = jax.random.split(root, 6)

    model = VariationalLatentVADPallas(emotions, D_in, H, k_model)

    context = jax.random.normal(k_ctx, (B, S, D_in), jnp.float32)
    mask_src = jnp.ones((B, 1, S), jnp.float32)
    emo_context_label = [0, 3]
    enc_batch = context  # unused by forward

    # prior branch (default mode)
    z_context, vad_loss, latent_params = model.forward(
        context, mask_src, emo_context_label, enc_batch,
        mode="prior", rng_key=k_eps)
    jax.block_until_ready(vad_loss)
    for name in LATENT_VARS:
        jax.block_until_ready(latent_params[name].z)

    # posterior branch
    vad_rep = (jax.random.normal(k_vad0, (B, S, D_in), jnp.float32),
               jax.random.normal(k_vad1, (B, S, D_in), jnp.float32),
               jax.random.normal(k_vad2, (B, S, D_in), jnp.float32))
    post_params = model.forward(context, mask_src, emo_context_label, enc_batch,
                                mode="posterior", vad_rep=vad_rep, rng_key=k_eps)
    jax.block_until_ready(post_params["V"].z)

    assert latent_params["V"].z.shape == (B, OUTPUT_DIM)
    assert latent_params["D"].mu.shape == (B, OUTPUT_DIM)
    assert z_context[0].shape == (B, 1, OUTPUT_DIM)
    assert post_params["A"].mu.shape == (B, OUTPUT_DIM)
    assert vad_loss.shape == ()
    print("KERNEL_OK")
</pallas_src>

<mosaic_0001>
module attributes {stable_mosaic.version = 11 : i64} {
  func.func @_prior_kernel(%arg0: memref<2x32xf32, #tpu.memory_space<vmem>>, %arg1: memref<32x2304xbf16, #tpu.memory_space<vmem>>, %arg2: memref<1x2304xf32, #tpu.memory_space<vmem>>, %arg3: memref<2x1152xbf16, #tpu.memory_space<vmem>>, %arg4: memref<3x384xf32, #tpu.memory_space<vmem>>, %arg5: memref<1x3xf32, #tpu.memory_space<vmem>>, %arg6: memref<2x3xf32, #tpu.memory_space<vmem>>, %arg7: memref<2x2304xf32, #tpu.memory_space<vmem>>, %arg8: memref<2x1152xf32, #tpu.memory_space<vmem>>, %arg9: memref<1x1xf32, #tpu.memory_space<vmem>>) attributes {dimension_semantics = [], scalar_prefetch = 0 : i64, scratch_operands = 0 : i64, tpu.core_type = #tpu.core_type<tc>} {
    %c0 = arith.constant 0 : index
    %c0_0 = arith.constant 0 : index
    %0 = vector.load %arg0[%c0, %c0_0] : memref<2x32xf32, #tpu.memory_space<vmem>>, vector<2x32xf32>
    %1 = arith.truncf %0 : vector<2x32xf32> to vector<2x32xbf16>
    %c0_1 = arith.constant 0 : index
    %c0_2 = arith.constant 0 : index
    %2 = vector.load %arg1[%c0_1, %c0_2] : memref<32x2304xbf16, #tpu.memory_space<vmem>>, vector<32x2304xbf16>
    %cst = arith.constant dense<0.000000e+00> : vector<2x2304xf32>
    %3 = tpu.matmul %1, %2, %cst {dimension_numbers = #tpu.dot_dimension_numbers<[1], [0], [0], [1], [0, 0, 1, 1], [], []>} : vector<2x32xbf16>, vector<32x2304xbf16>, vector<2x2304xf32> -> vector<2x2304xf32>
    %c0_3 = arith.constant 0 : index
    %c0_4 = arith.constant 0 : index
    %4 = vector.load %arg2[%c0_3, %c0_4] : memref<1x2304xf32, #tpu.memory_space<vmem>>, vector<1x2304xf32>
    %5 = vector.broadcast %4 : vector<1x2304xf32> to vector<2x2304xf32>
    %6 = arith.addf %3, %5 : vector<2x2304xf32>
    %cst_5 = arith.constant 0.000000e+00 : f32
    %7 = vector.broadcast %cst_5 : f32 to vector<2x2304xf32>
    %8 = arith.maximumf %6, %7 : vector<2x2304xf32>
    %9 = vector.extract_strided_slice %8 {offsets = [0, 0], sizes = [2, 1152], strides = [1, 1]} : vector<2x2304xf32> to vector<2x1152xf32>
    %10 = vector.extract_strided_slice %8 {offsets = [0, 1152], sizes = [2, 1152], strides = [1, 1]} : vector<2x2304xf32> to vector<2x1152xf32>
    %c0_6 = arith.constant 0 : index
    %c0_7 = arith.constant 0 : index
    %11 = vector.load %arg3[%c0_6, %c0_7] : memref<2x1152xbf16, #tpu.memory_space<vmem>>, vector<2x1152xbf16>
    %12 = arith.extf %11 : vector<2x1152xbf16> to vector<2x1152xf32>
    %cst_8 = arith.constant 5.000000e-01 : f32
    %13 = vector.broadcast %cst_8 : f32 to vector<2x1152xf32>
    %14 = arith.mulf %13, %10 : vector<2x1152xf32>
    %15 = math.exp %14 : vector<2x1152xf32>
    %16 = arith.mulf %12, %15 : vector<2x1152xf32>
    %17 = arith.addf %9, %16 : vector<2x1152xf32>
    %c0_9 = arith.constant 0 : index
    %c0_10 = arith.constant 0 : index
    %18 = vector.load %arg7[%c0_9, %c0_10] : memref<2x2304xf32, #tpu.memory_space<vmem>>, vector<2x2304xf32>
    tpu.vector_store %arg7[%c0_9, %c0_10], %8 {strides = array<i32>} : memref<2x2304xf32, #tpu.memory_space<vmem>>, vector<2x2304xf32>,
    %c0_11 = arith.constant 0 : index
    %c0_12 = arith.constant 0 : index
    %19 = vector.load %arg8[%c0_11, %c0_12] : memref<2x1152xf32, #tpu.memory_space<vmem>>, vector<2x1152xf32>
    tpu.vector_store %arg8[%c0_11, %c0_12], %17 {strides = array<i32>} : memref<2x1152xf32, #tpu.memory_space<vmem>>, vector<2x1152xf32>,
    %c0_13 = arith.constant 0 : index
    %c0_14 = arith.constant 0 : index
    %20 = vector.load %arg4[%c0_13, %c0_14] : memref<3x384xf32, #tpu.memory_space<vmem>>, vector<3x384xf32>
    %c0_15 = arith.constant 0 : index
    %c0_16 = arith.constant 0 : index
    %21 = vector.load %arg5[%c0_15, %c0_16] : memref<1x3xf32, #tpu.memory_space<vmem>>, vector<1x3xf32>
    %c0_17 = arith.constant 0 : index
    %c0_18 = arith.constant 0 : index
    %22 = vector.load %arg6[%c0_17, %c0_18] : memref<2x3xf32, #tpu.memory_space<vmem>>, vector<2x3xf32>
    %cst_19 = arith.constant 0.000000e+00 : f32
    %23 = vector.broadcast %cst_19 : f32 to vector<2x1xf32>
    %24 = vector.extract_strided_slice %17 {offsets = [0, 0], sizes = [2, 384], strides = [1, 1]} : vector<2x1152xf32> to vector<2x384xf32>
    %25 = vector.extract_strided_slice %20 {offsets = [0, 0], sizes = [1, 384], strides = [1, 1]} : vector<3x384xf32> to vector<1x384xf32>
    %26 = vector.broadcast %25 : vector<1x384xf32> to vector<2x384xf32>
    %27 = arith.mulf %24, %26 : vector<2x384xf32>
    %cst_20 = arith.constant dense<0.000000e+00> : vector<2xf32>
    %28 = vector.multi_reduction <add>, %27, %cst_20 [1] : vector<2x384xf32> to vector<2xf32>
    %29 = vector.shape_cast %28 : vector<2xf32> to vector<2x1xf32>
    %30 = vector.extract_strided_slice %21 {offsets = [0, 0], sizes = [1, 1], strides = [1, 1]} : vector<1x3xf32> to vector<1x1xf32>
    %31 = vector.broadcast %30 : vector<1x1xf32> to vector<2x1xf32>
    %32 = arith.addf %29, %31 : vector<2x1xf32>
    %33 = arith.negf %32 : vector<2x1xf32>
    %34 = math.exp %33 : vector<2x1xf32>
    %cst_21 = arith.constant 1.000000e+00 : f32
    %35 = vector.broadcast %cst_21 : f32 to vector<2x1xf32>
    %36 = arith.addf %35, %34 : vector<2x1xf32>
    %37 = arith.divf %35, %36 : vector<2x1xf32>
    %38 = vector.extract_strided_slice %22 {offsets = [0, 0], sizes = [2, 1], strides = [1, 1]} : vector<2x3xf32> to vector<2x1xf32>
    %39 = arith.subf %37, %38 : vector<2x1xf32>
    %40 = arith.mulf %39, %39 : vector<2x1xf32>
    %41 = arith.addf %23, %40 : vector<2x1xf32>
    %42 = vector.extract_strided_slice %17 {offsets = [0, 384], sizes = [2, 384], strides = [1, 1]} : vector<2x1152xf32> to vector<2x384xf32>
    %43 = vector.extract_strided_slice %20 {offsets = [1, 0], sizes = [1, 384], strides = [1, 1]} : vector<3x384xf32> to vector<1x384xf32>
    %44 = vector.broadcast %43 : vector<1x384xf32> to vector<2x384xf32>
    %45 = arith.mulf %42, %44 : vector<2x384xf32>
    %cst_22 = arith.constant dense<0.000000e+00> : vector<2xf32>
    %46 = vector.multi_reduction <add>, %45, %cst_22 [1] : vector<2x384xf32> to vector<2xf32>
    %47 = vector.shape_cast %46 : vector<2xf32> to vector<2x1xf32>
    %48 = vector.extract_strided_slice %21 {offsets = [0, 1], sizes = [1, 1], strides = [1, 1]} : vector<1x3xf32> to vector<1x1xf32>
    %49 = vector.broadcast %48 : vector<1x1xf32> to vector<2x1xf32>
    %50 = arith.addf %47, %49 : vector<2x1xf32>
    %51 = arith.negf %50 : vector<2x1xf32>
    %52 = math.exp %51 : vector<2x1xf32>
    %cst_23 = arith.constant 1.000000e+00 : f32
    %53 = vector.broadcast %cst_23 : f32 to vector<2x1xf32>
    %54 = arith.addf %53, %52 : vector<2x1xf32>
    %55 = arith.divf %53, %54 : vector<2x1xf32>
    %56 = vector.extract_strided_slice %22 {offsets = [0, 1], sizes = [2, 1], strides = [1, 1]} : vector<2x3xf32> to vector<2x1xf32>
    %57 = arith.subf %55, %56 : vector<2x1xf32>
    %58 = arith.mulf %57, %57 : vector<2x1xf32>
    %59 = arith.addf %41, %58 : vector<2x1xf32>
    %60 = vector.extract_strided_slice %17 {offsets = [0, 768], sizes = [2, 384], strides = [1, 1]} : vector<2x1152xf32> to vector<2x384xf32>
    %61 = vector.extract_strided_slice %20 {offsets = [2, 0], sizes = [1, 384], strides = [1, 1]} : vector<3x384xf32> to vector<1x384xf32>
    %62 = vector.broadcast %61 : vector<1x384xf32> to vector<2x384xf32>
    %63 = arith.mulf %60, %62 : vector<2x384xf32>
    %cst_24 = arith.constant dense<0.000000e+00> : vector<2xf32>
    %64 = vector.multi_reduction <add>, %63, %cst_24 [1] : vector<2x384xf32> to vector<2xf32>
    %65 = vector.shape_cast %64 : vector<2xf32> to vector<2x1xf32>
    %66 = vector.extract_strided_slice %21 {offsets = [0, 2], sizes = [1, 1], strides = [1, 1]} : vector<1x3xf32> to vector<1x1xf32>
    %67 = vector.broadcast %66 : vector<1x1xf32> to vector<2x1xf32>
    %68 = arith.addf %65, %67 : vector<2x1xf32>
    %69 = arith.negf %68 : vector<2x1xf32>
    %70 = math.exp %69 : vector<2x1xf32>
    %cst_25 = arith.constant 1.000000e+00 : f32
    %71 = vector.broadcast %cst_25 : f32 to vector<2x1xf32>
    %72 = arith.addf %71, %70 : vector<2x1xf32>
    %73 = arith.divf %71, %72 : vector<2x1xf32>
    %74 = vector.extract_strided_slice %22 {offsets = [0, 2], sizes = [2, 1], strides = [1, 1]} : vector<2x3xf32> to vector<2x1xf32>
    %75 = arith.subf %73, %74 : vector<2x1xf32>
    %76 = arith.mulf %75, %75 : vector<2x1xf32>
    %77 = arith.addf %59, %76 : vector<2x1xf32>
    %78 = vector.shape_cast %77 : vector<2x1xf32> to vector<1x2x1xf32>
    %cst_26 = arith.constant dense<0.000000e+00> : vector<1xf32>
    %79 = vector.multi_reduction <add>, %78, %cst_26 [1, 2] : vector<1x2x1xf32> to vector<1xf32>
    %80 = vector.shape_cast %79 : vector<1xf32> to vector<1x1x1xf32>
    %81 = vector.extract %80[0, 0, 0] : f32 from vector<1x1x1xf32>
    %82 = vector.broadcast %81 : f32 to vector<1x1xf32>
    %c0_27 = arith.constant 0 : index
    %c0_28 = arith.constant 0 : index
    %83 = vector.load %arg9[%c0_27, %c0_28] : memref<1x1xf32, #tpu.memory_space<vmem>>, vector<1x1xf32>
    tpu.vector_store %arg9[%c0_27, %c0_28], %82 {strides = array<i32>} : memref<1x1xf32, #tpu.memory_space<vmem>>, vector<1x1xf32>,
    return
  }
}

</mosaic_0001>

<bundles_post_ra>
// kernel: _run_prior.1
= control target key start
LH: loop header
LB: loop body
LE: loop exit
PB: predicated region body
PF: predicated region fallthrough
CT: control target
= control target key end

     0   :  { %15 = vsyncpa [#allocation3], 0  ;;  %s1986_s0 = inlined_call_operand.hbm [shape: f32[2,32], index: 0, kind: input, shape index: {}]   ;;  %s1987_s1 = inlined_call_operand.hbm [shape: bf16[32,2304], index: 1, kind: input, shape index: {}]   ;;  %s1988_s2 = inlined_call_operand.hbm [shape: f32[1,2304], index: 2, kind: input, shape index: {}]   ;;  %s1989_s3 = inlined_call_operand.hbm [shape: bf16[2,1152], index: 3, kind: input, shape index: {}]   ;;  %s1990_s4 = inlined_call_operand.vmem [shape: f32[3,384], index: 4, kind: input, shape index: {}]   ;;  %s1991_s5 = inlined_call_operand.vmem [shape: f32[1,3], index: 5, kind: input, shape index: {}]   ;;  %s1992_s6 = inlined_call_operand.vmem [shape: f32[2,3], index: 6, kind: input, shape index: {}]   ;;  %s1993_s7 = inlined_call_operand.hbm [shape: f32[2,2304], index: 7, kind: output, shape index: {0}]   ;;  %s1994_s8 = inlined_call_operand.hbm [shape: f32[2,1152], index: 8, kind: output, shape index: {1}]   ;;  %s1995_s9 = inlined_call_operand.hbm [shape: f32[1,1], index: 9, kind: output, shape index: {2}]  }
   0x1   :  { %16 = vsyncpa [#allocation6], 0 }
   0x2   :  { %17 = vsyncpa [#allocation9], 0 }
   0x3   :  { %18 = vsyncpa [#allocation4], 0 }
   0x4   :  { %19 = vsyncpa [#allocation12], 0  ;;  %s1630_s30 = smov [#allocation5]   ;;  %s1466_s13 = scalar_lea.hbm %s1987_s1, 4608 }
   0x5   :  { %s35_s10 = sshll.u32 %s1630_s30, 4  ;;  %p1467_p0 = scmp.ne.s32.totalorder %s1987_s1, %s1466_s13  ;;  %s36_s10 = int_to_ptr.vmem [resolvable:$true] %s35_s10 }
   0x6   :  { %p1470_p1 = scmp.lt.u32.totalorder %s1466_s13, %s1987_s1 }
   0x8   :  { %p1472_p2 = pnand %p1470_p1, %p1467_p0 }
   0xa   :  { %1475 = shalt.err (!%p1472_p2)
}
   0xb   :  { %s1476_s18 = scalar_lea.vmem %s36_s10, 4608  ;;  %p1481_p4 = scmp.lt.s32.totalorder %s36_s10, %s36_s10 }
   0xc   :  { %p1477_p3 = scmp.ne.s32.totalorder %s36_s10, %s1476_s18  ;;  %p1482_p5 = scmp.lt.s32.totalorder %s1476_s18, %s1476_s18 }
   0xe   :  { %p1483_p6 = por %p1482_p5, %p1481_p4 }
  0x10   :  { %p1484_p7 = pnand %p1483_p6, %p1477_p3 }
  0x12   :  { %1487 = shalt.err (!%p1484_p7)
}
  0x13   :  { %s1631_s19 = smov 1152   ;;  %s1632_s20 = smov 72  }
  0x14   :  { %41 = dma.hbm_to_vmem [thread:$0]  %s1987_s1, 4608, %s36_s10, [#allocation6], %s1631_s19, %s1631_s19, %s1632_s20  }
  0x15   :  { %s1633_s23 = smov [#allocation2]   ;;  %s1634_s25 = smov [#allocation7]  }
  0x16   :  { %s26_s24 = sshll.u32 %s1633_s23, 4  ;;  %s48_s26 = sshll.u32 %s1634_s25, 4  ;;  %s27_s24 = int_to_ptr.vmem [resolvable:$true] %s26_s24  ;;  %s49_s26 = int_to_ptr.vmem [resolvable:$true] %s48_s26 }
  0x17   :  { %s1488_s29 = scalar_lea.hbm %s1986_s0, 32 }
  0x18   :  { %p1489_p8 = scmp.ne.s32.totalorder %s1986_s0, %s1488_s29  ;;  %p1492_p9 = scmp.lt.u32.totalorder %s1488_s29, %s1986_s0 }
  0x1a   :  { %p1494_p10 = pnand %p1492_p9, %p1489_p8 }
  0x1c   :  { %1497 = shalt.err (!%p1494_p10)
}
  0x1d   :  { %s1498_s1 = scalar_lea.vmem %s27_s24, 32  ;;  %p1503_p12 = scmp.lt.s32.totalorder %s27_s24, %s27_s24 }
  0x1e   :  { %p1499_p11 = scmp.ne.s32.totalorder %s27_s24, %s1498_s1  ;;  %p1504_p13 = scmp.lt.s32.totalorder %s1498_s1, %s1498_s1 }
  0x20   :  { %p1505_p0 = por %p1504_p13, %p1503_p12 }
  0x22   :  { %p1506_p1 = pnand %p1505_p0, %p1499_p11 }
  0x24   :  { %1509 = shalt.err (!%p1506_p1)
}
  0x25   :  { %29 = dma.hbm_to_vmem [thread:$0]  %s1986_s0, 32, %s27_s24, [#allocation3]  }
  0x26   :  { %s1510_s17 = scalar_lea.hbm %s1988_s2, 288 }
  0x27   :  { %p1511_p2 = scmp.ne.s32.totalorder %s1988_s2, %s1510_s17  ;;  %p1514_p3 = scmp.lt.u32.totalorder %s1510_s17, %s1988_s2 }
  0x29   :  { %p1516_p4 = pnand %p1514_p3, %p1511_p2 }
  0x2b   :  { %1519 = shalt.err (!%p1516_p4)
}
  0x2c   :  { %s1520_s22 = scalar_lea.vmem %s49_s26, 288  ;;  %p1525_p6 = scmp.lt.s32.totalorder %s49_s26, %s49_s26 }
  0x2d   :  { %p1521_p5 = scmp.ne.s32.totalorder %s49_s26, %s1520_s22  ;;  %p1526_p7 = scmp.lt.s32.totalorder %s1520_s22, %s1520_s22 }
  0x2f   :  { %p1527_p8 = por %p1526_p7, %p1525_p6 }
  0x31   :  { %p1528_p9 = pnand %p1527_p8, %p1521_p5 }
  0x33   :  { %1531 = shalt.err (!%p1528_p9)
}
  0x34   :  { %51 = dma.hbm_to_vmem [thread:$0]  %s1988_s2, 288, %s49_s26, [#allocation6]  }
  0x35   :  { %s1635_s24 = smov [#allocation8]   ;;  %s1532_s29 = scalar_lea.hbm %s1989_s3, 144 }
  0x36   :  { %s58_s25 = sshll.u32 %s1635_s24, 4  ;;  %p1533_p10 = scmp.ne.s32.totalorder %s1989_s3, %s1532_s29  ;;  %s59_s25 = int_to_ptr.vmem [resolvable:$true] %s58_s25 }
  0x37   :  { %p1536_p11 = scmp.lt.u32.totalorder %s1532_s29, %s1989_s3 }
  0x39   :  { %p1538_p12 = pnand %p1536_p11, %p1533_p10 }
  0x3b   :  { %1541 = shalt.err (!%p1538_p12)
}
  0x3c   :  { %s1542_s1 = scalar_lea.vmem %s59_s25, 144  ;;  %s1546_s2 = scalar_lea.vmem %s59_s25, 160 }
  0x3d   :  { %p1543_p13 = scmp.ne.s32.totalorder %s59_s25, %s1542_s1  ;;  %p1547_p0 = scmp.lt.s32.totalorder %s59_s25, %s59_s25 }
  0x3e   :  { %p1548_p1 = scmp.lt.s32.totalorder %s1546_s2, %s1542_s1 }
  0x40   :  { %p1549_p2 = por %p1548_p1, %p1547_p0 }
  0x42   :  { %p1550_p3 = pnand %p1549_p2, %p1543_p13 }
  0x44   :  { %1553 = shalt.err (!%p1550_p3)
}
  0x45   :  { %61 = dma.hbm_to_vmem [thread:$0]  %s1989_s3, 144, %s59_s25, [#allocation9]  }
  0x46   :  { %1620 = dma.done.wait [#allocation3], 32  }
  0x47   :  { %1621 = vsyncadd [#allocation3], 4294967264 }
  0x48   :  { %1622 = dma.done.wait [#allocation6], 4896  }
  0x49   :  { %1623 = vsyncadd [#allocation6], 4294962400 }
  0x4a   :  { %1624 = dma.done.wait [#allocation9], 144  }
  0x4b   :  { %1625 = vsyncadd [#allocation9], 4294967152  ;;  %v1636_v0 = vmov 0   ;;  %v1382_v1 = vld [vmem:[#allocation5 + $0x4] ss:$72 sps:$4 sm:$0xff]   ;;  %vm395_vm0 = vcmask 261120   ;;  %v125_v39 = vlaneseq }
  0x4c   :  { %431 = vmatprep.mubr.bf16.mxu0 %v1636_v0  ;;  %472 = vmatprep.mubr.bf16.mxu1 %v1636_v0  ;;  %v1384_v2 = vld [vmem:[#allocation5 + $0xc] ss:$72 sps:$4 sm:$0xff]   ;;  %v1386_v3 = vld [vmem:[#allocation5] ss:$72 sps:$4 sm:$0xff]   ;;  %v1390_v6 = vld [vmem:[#allocation5 + $0x9c] ss:$72 sps:$4 sm:$0xff]  }
  0x4d   :  { %399 = vmatprep.subr.bf16.mxu0 %v1382_v1  ;;  %v1387_v4 = vld [vmem:[#allocation5 + $0x8] ss:$72 sps:$4 sm:$0xff]   ;;  %440 = vmatprep.subr.bf16.mxu1 %v1384_v2  ;;  %v1388_v5 = vld [vmem:[#allocation5 + $0x94] ss:$72 sps:$4 sm:$0xff]   ;;  %v1393_v8 = vld [vmem:[#allocation5 + $0x98] ss:$72 sps:$4 sm:$0xff]  }
  0x4e   :  { %400 = vmatpush1.bf16.msra.mxu0 %v1386_v3  ;;  %441 = vmatpush1.bf16.msra.mxu1 %v1387_v4  ;;  %v1392_v7 = vld [vmem:[#allocation5 + $0x90] ss:$72 sps:$4 sm:$0xff]   ;;  %v81_v9 = vld [vmem:[#allocation2] sm:$0x3]  ;;  %v1402_v15 = vld [vmem:[#allocation5 + $0xa4] ss:$72 sps:$4 sm:$0xff]  }
  0x4f   :  { %401 = vmatprep.subr.bf16.mxu0 %v1388_v5  ;;  %442 = vmatprep.subr.bf16.mxu1 %v1390_v6  ;;  %v1394_v10 = vld [vmem:[#allocation5 + $0x10] ss:$72 sps:$4 sm:$0xff]   ;;  %v1396_v11 = vld [vmem:[#allocation5 + $0x14] ss:$72 sps:$4 sm:$0xff]   ;;  %v1743_v12 = vpack.c.bf16 %v81_v9, %v81_v9  ;;  %v1400_v17 = vld [vmem:[#allocation5 + $0xa0] ss:$72 sps:$4 sm:$0xff]  }
  0x50   :  { %v1397_v13 = vld [vmem:[#allocation5 + $0x18] ss:$72 sps:$4 sm:$0xff]   ;;  %v1399_v14 = vld [vmem:[#allocation5 + $0x1c] ss:$72 sps:$4 sm:$0xff]   ;;  %v1405_v16 = vld [vmem:[#allocation5 + $0xac] ss:$72 sps:$4 sm:$0xff]  }
  0x51   :  { %v1403_v18 = vld [vmem:[#allocation5 + $0xa8] ss:$72 sps:$4 sm:$0xff]   ;;  %v1408_v19 = vld [vmem:[#allocation5 + $0x24] ss:$72 sps:$4 sm:$0xff]   ;;  %v1414_v23 = vld [vmem:[#allocation5 + $0xb4] ss:$72 sps:$4 sm:$0xff]  }
  0x52   :  { %402 = vmatpush1.bf16.msra.mxu0 %v1392_v7  ;;  %443 = vmatpush1.bf16.msra.mxu1 %v1393_v8  ;;  %v1411_v20 = vld [vmem:[#allocation5 + $0x2c] ss:$72 sps:$4 sm:$0xff]   ;;  %v1406_v21 = vld [vmem:[#allocation5 + $0x20] ss:$72 sps:$4 sm:$0xff]   ;;  %v1417_v24 = vld [vmem:[#allocation5 + $0xbc] ss:$72 sps:$4 sm:$0xff]  }
  0x53   :  { %481 = vmatprep.subr.bf16.mxu0 %v1396_v11  ;;  %522 = vmatprep.subr.bf16.mxu1 %v1399_v14  ;;  %v1409_v22 = vld [vmem:[#allocation5 + $0x28] ss:$72 sps:$4 sm:$0xff]   ;;  %v1415_v26 = vld [vmem:[#allocation5 + $0xb8] ss:$72 sps:$4 sm:$0xff]   ;;  %v1420_v27 = vld [vmem:[#allocation5 + $0x34] ss:$72 sps:$4 sm:$0xff]  }
  0x54   :  { %v1412_v25 = vld [vmem:[#allocation5 + $0xb0] ss:$72 sps:$4 sm:$0xff]   ;;  %v1423_v28 = vld [vmem:[#allocation5 + $0x3c] ss:$72 sps:$4 sm:$0xff]   ;;  %v1429_v32 = vld [vmem:[#allocation5 + $0xcc] ss:$72 sps:$4 sm:$0xff]  }
  0x55   :  { %1352 = vmatmul.mubr.msk.bf16.vlgmr.msra.gmra.mrb[0].mxu0 %vm395_vm0, %v1743_v12  ;;  %1353 = vmatmul.mubr.msk.bf16.vlgmr.msra.gmra.mrb[0].mxu1 %vm395_vm0, %v1743_v12  ;;  %v1418_v29 = vld [vmem:[#allocation5 + $0x30] ss:$72 sps:$4 sm:$0xff]   ;;  %v1426_v31 = vld [vmem:[#allocation5 + $0xc4] ss:$72 sps:$4 sm:$0xff]   ;;  %v1424_v33 = vld [vmem:[#allocation5 + $0xc0] ss:$72 sps:$4 sm:$0xff]  }
  0x56   :  { %482 = vmatpush1.bf16.msra.mxu0 %v1394_v10  ;;  %523 = vmatpush1.bf16.msra.mxu1 %v1397_v13  ;;  %v1421_v30 = vld [vmem:[#allocation5 + $0x38] ss:$72 sps:$4 sm:$0xff]   ;;  %v1427_v34 = vld [vmem:[#allocation5 + $0xc8] ss:$72 sps:$4 sm:$0xff]   ;;  %v1432_v35 = vld [vmem:[#allocation5 + $0x44] ss:$72 sps:$4 sm:$0xff]  }
  0x57   :  { %483 = vmatprep.subr.bf16.mxu0 %v1402_v15  ;;  %524 = vmatprep.subr.bf16.mxu1 %v1405_v16  ;;  %v1430_v36 = vld [vmem:[#allocation5 + $0x40] ss:$72 sps:$4 sm:$0xff]   ;;  %v1435_v37 = vld [vmem:[#allocation5 + $0xd4] ss:$72 sps:$4 sm:$0xff]   ;;  %v1433_v38 = vld [vmem:[#allocation5 + $0xd0] ss:$72 sps:$4 sm:$0xff]  }
  0x58   :  { %513 = vmatprep.mubr.bf16.mxu0 %v1636_v0  ;;  %554 = vmatprep.mubr.bf16.mxu1 %v1636_v0  ;;  %v1770_v40 = vshrl.u32 %v125_v39, 7  ;;  %v119_v43 = vld [vmem:[#allocation7] sm:$0xff]  ;;  %v1637_v46 = vmov 1983009808   ;;  %vm1132_vm1 = vcmask 1041408   ;;  %s1638_s19 = smov 127  }
  0x59   :  { %v830_v47 = vunpack.c.l.s4 %v1637_v46  ;;  %s1639_s20 = smov 126   ;;  %vm1258_vm2 = vcmask 1024   ;;  %s1641_s22 = smov [#allocation10]  }
  0x5a   :  { %484 = vmatpush1.bf16.msra.mxu0 %v1400_v17  ;;  %525 = vmatpush1.bf16.msra.mxu1 %v1403_v18  ;;  %v1773_v41 = vsub.s32 0, %v1770_v40  ;;  %v1776_v42 = vsub.s32 2, %v1770_v40  ;;  %v1779_v44 = vsub.s32 1, %v1770_v40  ;;  %v139_v45 = vsub.s32 3, %v1770_v40  ;;  %s1278_s0 = sshll.u32 %s1641_s22, 4  ;;  %s1279_s0 = int_to_ptr.vmem [resolvable:$true] %s1278_s0 }
  0x5b   :  { %563 = vmatprep.subr.bf16.mxu0 %v1408_v19  ;;  %604 = vmatprep.subr.bf16.mxu1 %v1411_v20  ;;  %v831_v54 = vunpack.c.0.s8 %v830_v47  ;;  %v1790_v59 = vsub.s32 4, %v1770_v40  ;;  %v1793_v60 = vsub.s32 6, %v1770_v40  ;;  %v1800_v1 = vsub.s32 5, %v1770_v40 }
  0x5c   :  { %v128_v48 = vrot.slane %v119_v43, %v1773_v41  ;;  %v136_v49 = vrot.slane %v119_v43, %v1776_v42  ;;  %v132_v50 = vrot.slane %v119_v43, %v1779_v44  ;;  %v140_v51 = vrot.slane %v119_v43, %v139_v45 }
  0x5d   :  { %1354 = vmatmul.mubr.msk.bf16.vlgmr.msra.gmra.mrb[4].mxu0 %vm395_vm0, %v1743_v12  ;;  %1355 = vmatmul.mubr.msk.bf16.vlgmr.msra.gmra.mrb[4].mxu1 %vm395_vm0, %v1743_v12  ;;  %v155_v2 = vsub.s32 7, %v1770_v40  ;;  %v1807_v8 = vsub.s32 %v831_v54, %v1770_v40  ;;  %v144_v10 = vrot.slane %v119_v43, %v1790_v59  ;;  %v152_v11 = vrot.slane %v119_v43, %v1793_v60 }
  0x5e   :  { %564 = vmatpush1.bf16.msra.mxu0 %v1406_v21  ;;  %605 = vmatpush1.bf16.msra.mxu1 %v1409_v22  ;;  %v148_v14 = vrot.slane %v119_v43, %v1800_v1 }
  0x5f   :  { %565 = vmatprep.subr.bf16.mxu0 %v1414_v23  ;;  %606 = vmatprep.subr.bf16.mxu1 %v1417_v24  ;;  %v156_v15 = vrot.slane %v119_v43, %v155_v2 }
  0x60   :  { %595 = vmatprep.mubr.bf16.mxu0 %v1636_v0  ;;  %636 = vmatprep.mubr.bf16.mxu1 %v1636_v0 }
  0x62   :  { %566 = vmatpush1.bf16.msra.mxu0 %v1412_v25  ;;  %607 = vmatpush1.bf16.msra.mxu1 %v1415_v26 }
  0x63   :  { %645 = vmatprep.subr.bf16.mxu0 %v1420_v27  ;;  %686 = vmatprep.subr.bf16.mxu1 %v1423_v28 }
  0x65   :  { %1356 = vmatmul.mubr.msk.bf16.vlgmr.msra.gmra.mrb[8].mxu0 %vm395_vm0, %v1743_v12  ;;  %1357 = vmatmul.mubr.msk.bf16.vlgmr.msra.gmra.mrb[8].mxu1 %vm395_vm0, %v1743_v12 }
  0x66   :  { %646 = vmatpush1.bf16.msra.mxu0 %v1418_v29  ;;  %687 = vmatpush1.bf16.msra.mxu1 %v1421_v30  ;;  %v120_v29 = vld [vmem:[#allocation7 + $0x8] sm:$0xff] }
  0x67   :  { %647 = vmatprep.subr.bf16.mxu0 %v1426_v31  ;;  %688 = vmatprep.subr.bf16.mxu1 %v1429_v32  ;;  %v164_v43 = vrot.slane %v120_v29, %v1779_v44  ;;  %v172_v46 = vrot.slane %v120_v29, %v139_v45 }
  0x68   :  { %677 = vmatprep.mubr.bf16.mxu0 %v1636_v0  ;;  %718 = vmatprep.mubr.bf16.mxu1 %v1636_v0 }
  0x6a   :  { %648 = vmatpush1.bf16.msra.mxu0 %v1424_v33  ;;  %689 = vmatpush1.bf16.msra.mxu1 %v1427_v34 }
  0x6b   :  { %727 = vmatprep.subr.bf16.mxu0 %v1432_v35 }
  0x6d   :  { %1358 = vmatmul.mubr.msk.bf16.vlgmr.msra.gmra.mrb[12].mxu0 %vm395_vm0, %v1743_v12  ;;  %1359 = vmatmul.mubr.msk.bf16.vlgmr.msra.gmra.mrb[12].mxu1 %vm395_vm0, %v1743_v12 }
  0x6e   :  { %728 = vmatpush1.bf16.msra.mxu0 %v1430_v36  ;;  %759 = vmatprep.mubr.bf16.mxu0 %v1636_v0  ;;  %v160_v36 = vrot.slane %v120_v29, %v1773_v41 }
  0x6f   :  { %729 = vmatprep.subr.bf16.mxu0 %v1435_v37  ;;  %v168_v37 = vrot.slane %v120_v29, %v1776_v42 }
  0x72   :  { %730 = vmatpush1.bf16.msra.mxu0 %v1433_v38 }
  0x75   :  { %1360 = vmatmul.mubr.msk.bf16.vlgmr.msra.gmra.mrb[16].mxu0 %vm395_vm0, %v1743_v12 }
 0x128   :  { %v433_v52 = vpop.f32.mrb[0].mxu0  ;;  %v474_v53 = vpop.f32.mrb[0].mxu1 }
 0x129   :  { %v1785_v55 = vadd.f32 %v433_v52, %v128_v48  ;;  %v1787_v56 = vadd.f32 %v474_v53, %v136_v49  ;;  %v435_v57 = vpop.f32.mrb[1].mxu0  ;;  %v476_v58 = vpop.f32.mrb[1].mxu1 }
 0x12a   :  { %v1795_v61 = vadd.f32 %v435_v57, %v132_v50  ;;  %v1797_v62 = vadd.f32 %v476_v58, %v140_v51  ;;  %v437_v63 = vpop.f32.mrb[2].mxu0  ;;  %v478_v0 = vpop.f32.mrb[2].mxu1 }
 0x12b   :  { %v768_v3 = vmax.f32 %v1785_v55, 0.0  ;;  %v770_v4 = vmax.f32 %v1787_v56, 0.0  ;;  %v438_v5 = vpop.f32.mrb[3].mxu0  ;;  %v479_v6 = vpop.f32.mrb[3].mxu1 }
 0x12c   :  { %v769_v7 = vmax.f32 %v1795_v61, 0.0  ;;  %v771_v9 = vmax.f32 %v1797_v62, 0.0 }
 0x12e   :  { %v954_v12 = vcombine.low %v768_v3, %v769_v7  ;;  %v955_v13 = vcombine.low %v770_v4, %v771_v9 }
 0x130   :  { %v962_v16 = vrot.slane %v954_v12, %v1807_v8  ;;  %v969_v17 = vrot.slane %v955_v13, %v1807_v8  ;;  %v515_v18 = vpop.f32.mrb[4].mxu0  ;;  %v556_v19 = vpop.f32.mrb[4].mxu1 }
 0x131   :  { %v1825_v20 = vadd.f32 %v515_v18, %v144_v10  ;;  %v1827_v21 = vadd.f32 %v556_v19, %v152_v11  ;;  %v517_v22 = vpop.f32.mrb[5].mxu0  ;;  %v558_v23 = vpop.f32.mrb[5].mxu1 }
 0x132   :  { %v970_v24 = vcombine.low %v962_v16, %v969_v17  ;;  %v1829_v25 = vadd.f32 %v517_v22, %v148_v14  ;;  %v1831_v26 = vadd.f32 %v558_v23, %v156_v15  ;;  %v519_v27 = vpop.f32.mrb[6].mxu0  ;;  %v560_v28 = vpop.f32.mrb[6].mxu1  ;;  %v176_v15 = vrot.slane %v120_v29, %v1790_v59 }
 0x133   :  { %v772_v30 = vmax.f32 %v1825_v20, 0.0  ;;  %v774_v31 = vmax.f32 %v1827_v21, 0.0  ;;  %v520_v32 = vpop.f32.mrb[7].mxu0  ;;  %v561_v33 = vpop.f32.mrb[7].mxu1  ;;  %v184_v16 = vrot.slane %v120_v29, %v1793_v60  ;;  %v180_v17 = vrot.slane %v120_v29, %v1800_v1 }
 0x134   :  { %1035 = vst [vmem:[#allocation10] sm:$0xff] %v970_v24  ;;  %v773_v34 = vmax.f32 %v1829_v25, 0.0  ;;  %v775_v35 = vmax.f32 %v1831_v26, 0.0  ;;  %v188_v23 = vrot.slane %v120_v29, %v155_v2  ;;  %v121_v29 = vld [vmem:[#allocation7 + $0x10] sm:$0x3] }
 0x136   :  { %v971_v38 = vcombine.low %v772_v30, %v773_v34  ;;  %v972_v39 = vcombine.low %v774_v31, %v775_v35 }
 0x138   :  { %v979_v47 = vrot.slane %v971_v38, %v1807_v8  ;;  %v986_v48 = vrot.slane %v972_v39, %v1807_v8  ;;  %v597_v49 = vpop.f32.mrb[8].mxu0  ;;  %v638_v50 = vpop.f32.mrb[8].mxu1 }
 0x139   :  { %v1850_v51 = vadd.f32 %v597_v49, %v160_v36  ;;  %v639_v52 = vadd.f32 %v638_v50, %v168_v37  ;;  %v599_v53 = vpop.f32.mrb[9].mxu0  ;;  %v640_v54 = vpop.f32.mrb[9].mxu1 }
 0x13a   :  { %v987_v57 = vcombine.low %v979_v47, %v986_v48  ;;  %v600_v58 = vadd.f32 %v599_v53, %v164_v43  ;;  %v641_v63 = vadd.f32 %v640_v54, %v172_v46  ;;  %v601_v0 = vpop.f32.mrb[10].mxu0  ;;  %v642_v5 = vpop.f32.mrb[10].mxu1 }
 0x13b   :  { %v776_v6 = vmax.f32 %v1850_v51, 0.0  ;;  %v778_v10 = vmax.f32 %v639_v52, 0.0  ;;  %v602_v45 = vpop.f32.mrb[11].mxu0  ;;  %v643_v11 = vpop.f32.mrb[11].mxu1 }
 0x13c   :  { %1036 = vst [vmem:[#allocation10 + $0x8] sm:$0xff] %v987_v57  ;;  %v777_v12 = vmax.f32 %v600_v58, 0.0  ;;  %v779_v13 = vmax.f32 %v641_v63, 0.0 }
 0x13d   :  { %v792_v14 = vmul.f32 0.5, %v778_v10 }
 0x13e   :  { %v791_v18 = vmul.f32 0.5, %v777_v12  ;;  %v988_v19 = vcombine.low %v776_v6, %v777_v12  ;;  %v989_v22 = vcombine.low %v778_v10, %v779_v13  ;;  %v793_v27 = vmul.f32 0.5, %v779_v13 }
 0x13f   :  { %v802_v24 = vmul.f32 1.442695, %v792_v14  ;;  %v192_v10 = vrot.slane %v121_v29, %v1773_v41  ;;  %v196_v13 = vrot.slane %v121_v29, %v1779_v44 }
 0x140   :  { %v800_v28 = vmul.f32 1.442695, %v791_v18  ;;  %v996_v32 = vrot.slane %v988_v19, %v1807_v8  ;;  %v1003_v33 = vrot.slane %v989_v22, %v1807_v8  ;;  %v679_v36 = vpop.f32.mrb[12].mxu0  ;;  %v720_v37 = vpop.f32.mrb[12].mxu1  ;;  %v804_v50 = vmul.f32 1.442695, %v793_v27 }
 0x141   :  { %1436 = vpow2.f32 %v802_v24  ;;  %v680_v38 = vadd.f32 %v679_v36, %v176_v15  ;;  %v721_v39 = vadd.f32 %v720_v37, %v184_v16  ;;  %v681_v43 = vpop.f32.mrb[13].mxu0  ;;  %v722_v46 = vpop.f32.mrb[13].mxu1 }
 0x142   :  { %1438 = vpow2.f32 %v800_v28  ;;  %v1004_v47 = vcombine.low %v996_v32, %v1003_v33  ;;  %v682_v48 = vadd.f32 %v681_v43, %v180_v17  ;;  %v723_v49 = vadd.f32 %v722_v46, %v188_v23  ;;  %v683_v40 = vpop.f32.mrb[14].mxu0  ;;  %v724_v2 = vpop.f32.mrb[14].mxu1 }
 0x143   :  { %v780_v52 = vmax.f32 %v680_v38, 0.0  ;;  %v782_v53 = vmax.f32 %v721_v39, 0.0  ;;  %v684_v54 = vpop.f32.mrb[15].mxu0  ;;  %v725_v57 = vpop.f32.mrb[15].mxu1  ;;  %1440 = vpow2.f32 %v804_v50 }
 0x144   :  { %1037 = vst [vmem:[#allocation10 + $0x10] sm:$0xff] %v1004_v47  ;;  %v781_v58 = vmax.f32 %v682_v48, 0.0  ;;  %v783_v63 = vmax.f32 %v723_v49, 0.0  ;;  %v1869_v57 = vld [vmem:[%s1990_s4] sm:$0x77] }
 0x145   :  { %v794_v0 = vmul.f32 0.5, %v780_v52  ;;  %v796_v5 = vmul.f32 0.5, %v782_v53  ;;  %v1214_v62 = vrot.slane %v1869_v57, %v1793_v60 }
 0x146   :  { %v795_v45 = vmul.f32 0.5, %v781_v58  ;;  %v1005_v11 = vcombine.low %v780_v52, %v781_v58  ;;  %v1006_v12 = vcombine.low %v782_v53, %v783_v63  ;;  %v797_v16 = vmul.f32 0.5, %v783_v63  ;;  %v786_v52 = vld [vmem:[#allocation8] sm:$0xff] }
 0x147   :  { %v806_v14 = vmul.f32 1.442695, %v794_v0  ;;  %v810_v15 = vmul.f32 1.442695, %v796_v5  ;;  %v1874_v63 = vld [vmem:[%s1990_s4 + $0x8] sm:$0x7]  ;;  %v788_v5 = vunpack.c.l.bf16 %v786_v52 }
 0x148   :  { %v808_v17 = vmul.f32 1.442695, %v795_v45  ;;  %v1013_v18 = vrot.slane %v1005_v11, %v1807_v8  ;;  %v1020_v19 = vrot.slane %v1006_v12, %v1807_v8  ;;  %v761_v22 = vpop.f32.mrb[16].mxu0  ;;  %v812_v36 = vmul.f32 1.442695, %v797_v16 }
 0x149   :  { %1442 = vpow2.f32 %v806_v14  ;;  %v762_v23 = vadd.f32 %v761_v22, %v192_v10  ;;  %v763_v24 = vpop.f32.mrb[17].mxu0  ;;  %v1105_v11 = vrot.slane %v1869_v57, %v1773_v41  ;;  %v1109_v12 = vrot.slane %v1869_v57, %v1790_v59 }
 0x14a   :  { %1444 = vpow2.f32 %v810_v15  ;;  %v1021_v27 = vcombine.low %v1013_v18, %v1020_v19  ;;  %v764_v28 = vadd.f32 %v763_v24, %v196_v13  ;;  %v765_v32 = vpop.f32.mrb[18].mxu0  ;;  %v1113_v14 = vrot.slane %v1874_v63, %v1773_v41  ;;  %v787_v15 = vld [vmem:[#allocation8 + $0x8] sm:$0x1] }
 0x14b   :  { %v1437_v33 = vpop.eup %1436  ;;  %1446 = vpow2.f32 %v808_v17  ;;  %v784_v37 = vmax.f32 %v762_v23, 0.0  ;;  %v766_v38 = vpop.f32.mrb[19].mxu0  ;;  %v1120_v19 = vrot.slane %v1105_v11, %v1773_v41  ;;  %v1124_v22 = vrot.slane %v1109_v12, %v1773_v41 }
 0x14c   :  { %v1439_v39 = vpop.eup %1438  ;;  %1038 = vst [vmem:[#allocation10 + $0x18] sm:$0xff] %v1021_v27  ;;  %v785_v43 = vmax.f32 %v764_v28, 0.0  ;;  %1448 = vpow2.f32 %v812_v36  ;;  %v790_v23 = vunpack.c.l.bf16 %v787_v15  ;;  %v1128_v59 = vrot.slane %v1113_v14, %v1773_v41 }
 0x14d   :  { %v827_v46 = vcombine.low %v1439_v39, %v1437_v33  ;;  %v798_v47 = vmul.f32 0.5, %v784_v37  ;;  %v1441_v29 = vpop.eup %1440  ;;  %v789_v33 = vunpack.c.h.bf16 %v786_v52  ;;  %v1159_v36 = vrot.slane %v1869_v57, %v1779_v44 }
 0x14e   :  { %v799_v48 = vmul.f32 0.5, %v785_v43  ;;  %v1022_v49 = vcombine.low %v784_v37, %v785_v43  ;;  %v1163_v37 = vrot.slane %v1869_v57, %v1800_v1  ;;  %v1167_v55 = vrot.slane %v1874_v63, %v1779_v44 }
 0x14f   :  { %v814_v40 = vmul.f32 1.442695, %v798_v47  ;;  %v835_v10 = vrot.slane %v827_v46, %v1807_v8 }
 0x150   :  { %v816_v2 = vmul.f32 1.442695, %v799_v48  ;;  %1361 = vst.sshfl [vmem:[#allocation10 + $0x20] sm:$0x33 pattern:$0x76325410] %v1022_v49  ;;  %v1218_v49 = vrot.slane %v1874_v63, %v1776_v42  ;;  %v1178_v61 = vrot.slane %v1163_v37, %v1779_v44  ;;  %v1182_v11 = vrot.slane %v1167_v55, %v1779_v44 }
 0x151   :  { %1450 = vpow2.f32 %v814_v40 }
 0x152   :  { %1452 = vpow2.f32 %v816_v2 }
 0x153   :  { %v1443_v50 = vpop.eup %1442 }
 0x154   :  { %v1445_v53 = vpop.eup %1444  ;;  %v828_v54 = vcombine.low %v1441_v29, %v1443_v50 }
 0x155   :  { %v1447_v58 = vpop.eup %1446 }
 0x156   :  { %v844_v0 = vcombine.low %v1447_v58, %v1445_v53  ;;  %v842_v45 = vrot.slane %v828_v54, %v1807_v8  ;;  %v1449_v16 = vpop.eup %1448 }
 0x158   :  { %v843_v13 = vcombine.low %v835_v10, %v842_v45  ;;  %v852_v41 = vrot.slane %v844_v0, %v1807_v8 }
 0x15a   :  { %v871_v17 = vmul.f32 %v843_v13, %v788_v5 }
 0x15b   :  { %v1451_v18 = vpop.eup %1450 }
 0x15c   :  { %v1453_v24 = vpop.eup %1452  ;;  %v845_v27 = vcombine.low %v1449_v16, %v1451_v18  ;;  %v877_v28 = vcombine.high %v871_v17, %v871_v17  ;;  %v884_v32 = vrot.slane %v871_v17, %v1807_v8  ;;  %v1233_v18 = vrot.slane %v1218_v49, %v1776_v42 }
 0x15d   :  { %v867_v38 = vrot.slane %v1453_v24, %v1807_v8 }
 0x15e   :  { %v891_v39 = vrot.slane %v877_v28, %v1807_v8  ;;  %v892_v43 = vcombine.high %v884_v32, %v884_v32  ;;  %v927_v46 = vadd.f32 %v884_v32, %v768_v3  ;;  %v859_v47 = vrot.slane %v845_v27, %v1807_v8 }
 0x15f   :  { %v873_v48 = vmul.f32 %v867_v38, %v790_v23  ;;  %v1174_v3 = vrot.slane %v1159_v36, %v1779_v44  ;;  %v1229_v44 = vrot.slane %v1214_v62, %v1776_v42 }
 0x160   :  { %v893_v40 = vcombine.high %v891_v39, %v891_v39  ;;  %v928_v1 = vadd.f32 %v892_v43, %v769_v7  ;;  %v929_v2 = vadd.f32 %v891_v39, %v770_v4  ;;  %v1129_v29 = vmul.f32 %v1120_v19, %v927_v46 }
 0x161   :  { %v860_v50 = vcombine.low %v852_v41, %v859_v47  ;;  %v917_v52 = vrot.slane %v873_v48, %v1807_v8  ;;  %v1210_v4 = vrot.slane %v1869_v57, %v1776_v42  ;;  %v1363_v41 = vld [vmem:[%s1991_s5] ss:$0 sm:$0xff] }
 0x162   :  { %v930_v53 = vadd.f32 %v893_v40, %v771_v9  ;;  %v1130_v54 = vmul.f32 %v1124_v22, %v928_v1  ;;  %v1131_v58 = vmul.f32 %v1128_v59, %v929_v2  ;;  %v1049_v7 = vcombine.low %v927_v46, %v928_v1 }
 0x163   :  { %v872_v0 = vmul.f32 %v860_v50, %v789_v33  ;;  %v935_v56 = vadd.f32 %v917_v52, %v776_v6  ;;  %v1133_v5 = vsel %vm1132_vm1, %v1129_v29, 0.0  ;;  %v1225_v57 = vrot.slane %v1210_v4, %v1776_v42 }
 0x164   :  { %v1050_v63 = vcombine.low %v929_v2, %v930_v53  ;;  %v1134_v10 = vsel %vm1132_vm1, %v1130_v54, 0.0  ;;  %v1136_v6 = vsel %vm1132_vm1, %v1131_v58, 0.0  ;;  %v1183_v13 = vmul.f32 %v1174_v3, %v930_v53 }
 0x165   :  { %v1135_v9 = vadd.f32 %v1134_v10, %v1133_v5  ;;  %v901_v45 = vrot.slane %v872_v0, %v1807_v8  ;;  %v894_v12 = vcombine.high %v872_v0, %v872_v0  ;;  %1362 = vst.sshfl [vmem:[#allocation11 + $0x10] sm:$0x3 pattern:$0x76325410] %v935_v56  ;;  %v1057_v14 = vrot.slane %v1049_v7, %v1807_v8 }
 0x166   :  { %v1064_v51 = vrot.slane %v1050_v63, %v1807_v8  ;;  %v1186_v20 = vsel %vm1132_vm1, %v1183_v13, 0.0  ;;  %v1236_v36 = vmul.f32 %v1233_v18, %v935_v56 }
 0x167   :  { %v1137_v15 = vadd.f32 %v1136_v6, %v1135_v9  ;;  %v909_v16 = vcombine.high %v901_v45, %v901_v45  ;;  %v931_v17 = vadd.f32 %v901_v45, %v772_v30  ;;  %v908_v60 = vrot.slane %v894_v12, %v1807_v8 }
 0x168   :  { %v1065_v19 = vcombine.low %v1057_v14, %v1064_v51  ;;  %v1240_v26 = vsel %vm1132_vm1, %v1236_v36, 0.0 }
 0x169   :  { %1138 = vadd.xlane.f32.xlu1 %v1137_v15  ;;  %v932_v22 = vadd.f32 %v909_v16, %v773_v34  ;;  %v1184_v23 = vmul.f32 %v1178_v61, %v931_v17  ;;  %v910_v24 = vcombine.high %v908_v60, %v908_v60  ;;  %v933_v27 = vadd.f32 %v908_v60, %v774_v31  ;;  %v1099_v61 = vld [vmem:[%s1992_s6] sm:$0x3]  ;;  %s1640_s6 = smov [#allocation11]  }
 0x16a   :  { %1093 = vst [vmem:[#allocation11] sm:$0xff] %v1065_v19  ;;  %s1288_s21 = sshll.u32 %s1640_s6, 4  ;;  %s1289_s21 = int_to_ptr.vmem [resolvable:$true] %s1288_s21 }
 0x16b   :  { %v1185_v30 = vmul.f32 %v1182_v11, %v932_v22  ;;  %v1187_v28 = vsel %vm1132_vm1, %v1184_v23, 0.0  ;;  %v1066_v32 = vcombine.low %v931_v17, %v932_v22  ;;  %v934_v42 = vadd.f32 %v910_v24, %v775_v35  ;;  %s1554_s23 = scalar_lea.vmem %s1289_s21, 288  ;;  %p1559_p5 = scmp.lt.s32.totalorder %s1289_s21, %s1289_s21 }
 0x16c   :  { %v1188_v59 = vadd.f32 %v1187_v28, %v1186_v20  ;;  %v1234_v33 = vmul.f32 %v1225_v57, %v933_v27  ;;  %p1555_p4 = scmp.ne.s32.totalorder %s1289_s21, %s1554_s23  ;;  %p1560_p6 = scmp.lt.s32.totalorder %s1554_s23, %s1554_s23 }
 0x16d   :  { %v1189_v25 = vsel %vm1132_vm1, %v1185_v30, 0.0  ;;  %v1074_v34 = vrot.slane %v1066_v32, %v1807_v8  ;;  %v1067_v37 = vcombine.low %v933_v27, %v934_v42  ;;  %v1235_v21 = vmul.f32 %v1229_v44, %v934_v42 }
 0x16e   :  { %v1190_v31 = vadd.f32 %v1189_v25, %v1188_v59  ;;  %v1237_v38 = vsel %vm1132_vm1, %v1234_v33, 0.0  ;;  %p1561_p7 = por %p1560_p6, %p1559_p5 }
 0x16f   :  { %v1238_v39 = vsel %vm1132_vm1, %v1235_v21, 0.0  ;;  %v1081_v43 = vrot.slane %v1067_v37, %v1807_v8 }
 0x170   :  { %1191 = vadd.xlane.f32.xlu0 %v1190_v31  ;;  %v1239_v46 = vadd.f32 %v1238_v39, %v1237_v38  ;;  %p1562_p8 = pnand %p1561_p7, %p1555_p4 }
 0x171   :  { %v1082_v35 = vcombine.low %v1074_v34, %v1081_v43 }
 0x172   :  { %v1241_v47 = vadd.f32 %v1240_v26, %v1239_v46 }
 0x173   :  { %1094 = vst [vmem:[#allocation11 + $0x8] sm:$0xff] %v1082_v35 }
 0x174   :  { %1242 = vadd.xlane.f32.xlu0 %v1241_v47 }
 0x1f6   :  { %v1139_v48 = vpop.xlane.xlu1 %1138 }
 0x1f7   :  { %v1146_v49 = vadd.f32 %v1363_v41, %v1139_v48 }
 0x1f9   :  { %v1364_v40 = vmul.f32 -1.442695, %v1146_v49 }
 0x1fb   :  { %1454 = vpow2.f32 %v1364_v40 }
 0x1fd   :  { %v1192_v1 = vpop.xlane.xlu0 %1191 }
 0x1fe   :  { %v1193_v2 = vadd.f32 %v1363_v41, %v1192_v1 }
 0x200   :  { %v1365_v29 = vmul.f32 -1.442695, %v1193_v2 }
 0x201   :  { %v1243_v8 = vpop.xlane.xlu0 %1242 }
 0x202   :  { %1456 = vpow2.f32 %v1365_v29  ;;  %v1244_v50 = vadd.f32 %v1363_v41, %v1243_v8 }
 0x204   :  { %v1366_v55 = vmul.f32 -1.442695, %v1244_v50 }
 0x205   :  { %v1455_v3 = vpop.eup %1454 }
 0x206   :  { %v1150_v52 = vadd.f32 1.0, %v1455_v3  ;;  %1458 = vpow2.f32 %v1366_v55 }
 0x208   :  { %1460 = vrcp.f32 %v1150_v52 }
 0x20c   :  { %v1457_v53 = vpop.eup %1456 }
 0x20d   :  { %v1197_v54 = vadd.f32 1.0, %v1457_v53 }
 0x20f   :  { %1462 = vrcp.f32 %v1197_v54 }
 0x210   :  { %v1459_v58 = vpop.eup %1458 }
 0x211   :  { %v1248_v7 = vadd.f32 1.0, %v1459_v58 }
 0x212   :  { %v1461_v0 = vpop.eup %1460 }
 0x213   :  { %1464 = vrcp.f32 %v1248_v7  ;;  %v1153_v56 = vsub.f32 %v1461_v0, %v1099_v61 }
 0x215   :  { %v1154_v11 = vmul.f32 %v1153_v56, %v1153_v56 }
 0x219   :  { %v1463_v4 = vpop.eup %1462 }
 0x21a   :  { %v1200_v63 = vsub.f32 %v1463_v4, %v1099_v61 }
 0x21c   :  { %v1201_v5 = vmul.f32 %v1200_v63, %v1200_v63 }
 0x21d   :  { %v1465_v10 = vpop.eup %1464 }
 0x21e   :  { %1203 = vrot.lane.b32.xlu1 %v1201_v5, %s1638_s19  ;;  %v1251_v62 = vsub.f32 %v1465_v10, %v1099_v61 }
 0x220   :  { %v1252_v9 = vmul.f32 %v1251_v62, %v1251_v62 }
 0x222   :  { %1254 = vrot.lane.b32.xlu0 %v1252_v9, %s1639_s20 }
 0x290   :  { %v1204_v45 = vpop.permute.xlu1 %1203 }
 0x291   :  { %v1206_v12 = vadd.f32 %v1204_v45, %v1154_v11 }
 0x294   :  { %v1255_v51 = vpop.permute.xlu0 %1254 }
 0x295   :  { %v1257_v6 = vadd.f32 %v1255_v51, %v1206_v12 }
 0x297   :  { %v1259_v13 = vsel %vm1258_vm2, %v1257_v6, 0.0 }
 0x298   :  { %1260 = vadd.xlane.f32.xlu1 %v1259_v13 }
 0x299   :  { %1565 = shalt.err (!%p1562_p8)
}
 0x29a   :  { %s1566_s27 = scalar_lea.hbm %s1994_s8, 288 }
 0x29b   :  { %p1567_p9 = scmp.ne.s32.totalorder %s1994_s8, %s1566_s27  ;;  %p1570_p10 = scmp.lt.u32.totalorder %s1566_s27, %s1994_s8 }
 0x29d   :  { %p1572_p11 = pnand %p1570_p10, %p1567_p9 }
 0x29f   :  { %1575 = shalt.err (!%p1572_p11)
}
 0x2a0   :  { %1291 = dma.vmem_to_hbm [thread:$0]  %s1289_s21, 288, %s1994_s8, [#allocation12]  }
 0x2a1   :  { %s1576_s1 = scalar_lea.vmem %s1279_s0, 576  ;;  %p1581_p13 = scmp.lt.s32.totalorder %s1279_s0, %s1279_s0 }
 0x2a2   :  { %p1577_p12 = scmp.ne.s32.totalorder %s1279_s0, %s1576_s1  ;;  %p1582_p0 = scmp.lt.s32.totalorder %s1576_s1, %s1576_s1 }
 0x2a4   :  { %p1583_p1 = por %p1582_p0, %p1581_p13 }
 0x2a6   :  { %p1584_p2 = pnand %p1583_p1, %p1577_p12 }
 0x2a8   :  { %1587 = shalt.err (!%p1584_p2)
}
 0x2a9   :  { %s1588_s10 = scalar_lea.hbm %s1993_s7, 576 }
 0x2aa   :  { %p1589_p3 = scmp.ne.s32.totalorder %s1993_s7, %s1588_s10  ;;  %p1592_p4 = scmp.lt.u32.totalorder %s1588_s10, %s1993_s7 }
 0x2ac   :  { %p1594_p5 = pnand %p1592_p4, %p1589_p3 }
 0x2ae   :  { %1597 = shalt.err (!%p1594_p5)
}
 0x2af   :  { %1281 = dma.vmem_to_hbm [thread:$0]  %s1279_s0, 576, %s1993_s7, [#allocation4]   ;;  %vm1270_vm3 = vcmask 0  }
 0x2b0   :  { %s1642_s17 = smov [#allocation13]  }
 0x2b1   :  { %s1298_s5 = sshll.u32 %s1642_s17, 4  ;;  %s1299_s5 = int_to_ptr.vmem [resolvable:$true] %s1298_s5 }
 0x2b2   :  { %s1598_s19 = scalar_lea.vmem %s1299_s5, 16  ;;  %s1602_s20 = scalar_lea.vmem %s1299_s5, 32 }
 0x2b3   :  { %p1599_p6 = scmp.ne.s32.totalorder %s1299_s5, %s1598_s19  ;;  %p1603_p7 = scmp.lt.s32.totalorder %s1299_s5, %s1299_s5 }
 0x2b4   :  { %p1604_p8 = scmp.lt.s32.totalorder %s1602_s20, %s1598_s19 }
 0x2b6   :  { %p1605_p9 = por %p1604_p8, %p1603_p7 }
 0x2b8   :  { %p1606_p10 = pnand %p1605_p9, %p1599_p6 }
 0x325   :  { %v1261_v14 = vpop.xlane.xlu1 %1260 }
 0x326   :  { %v1262_v15 = vrot.slane %v1261_v14, 4 }
 0x328   :  { %v1263_v16 = vadd.f32 %v1262_v15, %v1261_v14 }
 0x32a   :  { %v1264_v17 = vrot.slane %v1263_v16, 2 }
 0x32c   :  { %v1265_v60 = vadd.f32 %v1264_v17, %v1263_v16 }
 0x32e   :  { %v1266_v57 = vrot.slane %v1265_v60, 1 }
 0x330   :  { %v1267_v44 = vadd.f32 %v1266_v57, %v1265_v60 }
 0x332   :  { %1367 = vpush %v1267_v44 }
 0x363   :  { %s1368_s18 = spop %1367 }
 0x364   :  { %v1269_v18 = vstv %s1368_s18 }
 0x365   :  { %1271 = vst.msk [vmem:[#allocation13] sm:$0x1] %vm1270_vm3, %v1269_v18 }
 0x366   :  { %1609 = shalt.err (!%p1606_p10)
}
 0x367   :  { %s1610_s21 = scalar_lea.hbm %s1995_s9, 16 }
 0x368   :  { %p1611_p11 = scmp.ne.s32.totalorder %s1995_s9, %s1610_s21  ;;  %p1614_p12 = scmp.lt.u32.totalorder %s1610_s21, %s1995_s9 }
 0x36a   :  { %p1616_p13 = pnand %p1614_p12, %p1611_p11 }
 0x36c   :  { %1619 = shalt.err (!%p1616_p13)
}
 0x36d   :  { %1301 = dma.vmem_to_hbm [thread:$0]  %s1299_s5, 16, %s1995_s9, [#allocation12]  }
 0x36e   :  { %1626 = dma.done.wait [#allocation4], 576  }
 0x36f   :  { %1627 = vsyncadd [#allocation4], 4294966720 }
 0x370   :  { %1628 = dma.done.wait [#allocation12], 304  }
 0x371   :  { %1629 = vsyncadd [#allocation12], 4294966992 }
 0x372   :  { %1311 = vsyncpa [#allocation3], 1 }
 0x373   :  { %1312 = vsyncpa [#allocation6], 1 }
 0x374   :  { %1313 = vsyncpa [#allocation9], 1 }
 0x375   :  { %1314 = vsyncpa [#allocation4], 1 }
 0x376   :  { %1315 = vsyncpa [#allocation12], 1 }

</bundles_post_ra>
